<compile_context>
chip_gen: v7x
topology: tpu7x:2x2x1
jax: 0.10.0
libtpu: 0.0.40
codegen_flags: <defaults>
</compile_context>

<pallas_src>
import jax
import jax.numpy as jnp
from jax.experimental import pallas as pl
from jax.experimental.pallas import tpu as pltpu

NUM_LAYERS = 3
HIDDEN = 32
BATCH = 2
SEQ = 8

LANE = 128      # vreg lane width
SUBLANE = 8     # vreg sublane count (f32)


def _round_up(n, m):
    return ((n + m - 1) // m) * m


def _stacked_linear_kernel(x_ref, w_ref, b_ref, o_ref):
    """One M-tile grid step: run the whole Linear stack on this tile.

    x_ref : [tm, Hp]       bf16 input tile
    w_ref : [L, Hp, Hp]    bf16 pre-transposed weight stack (resident in VMEM)
    b_ref : [L, 1, Hp]     f32 bias stack
    o_ref : [tm, Hp]       output tile
    """
    num_layers = w_ref.shape[0]
    act = x_ref[...]                                    # bf16, lives in vregs
    for l in range(num_layers):                         # static trip count -> unrolled
        acc = (
            jnp.dot(act, w_ref[l], preferred_element_type=jnp.float32)
            + b_ref[l]
        )
        act = acc.astype(jnp.bfloat16)                  # matches reference numerics
    o_ref[...] = act.astype(o_ref.dtype)


def prepare_params(w_torch, b_stack, hidden_padded):
    """One-time preprocessing (hoisted off the forward critical path).

    w_torch : [L, out, in] f32 torch-style weights
    b_stack : [L, out]     f32 biases
    Returns (w_p [L, Hp, Hp] bf16 transposed, b_p [L, 1, Hp] f32).
    """
    num_layers, out_dim, in_dim = w_torch.shape
    w_t = jnp.transpose(w_torch, (0, 2, 1)).astype(jnp.bfloat16)   # x @ W.T == x @ W_t
    w_p = jnp.pad(
        w_t, ((0, 0), (0, hidden_padded - in_dim), (0, hidden_padded - out_dim))
    )
    b_p = jnp.pad(b_stack, ((0, 0), (0, hidden_padded - out_dim))).reshape(
        num_layers, 1, hidden_padded
    )
    return w_p, b_p


def multi_module_forward(x, w_p, b_p, *, tm=256):
    """Sequential Linear stack fused into one Pallas kernel.

    x   : [batch, seq, hidden]  (bf16)
    w_p : [L, Hp, Hp]           pre-transposed, pre-padded bf16 weights
    b_p : [L, 1, Hp]            pre-padded f32 biases
    """
    batch, seq, hidden = x.shape
    num_layers, hp, _ = w_p.shape
    m = batch * seq

    # Round tm up to a sublane multiple, then clamp so one tile covers small M.
    tm = _round_up(max(SUBLANE, min(tm, _round_up(m, SUBLANE))), SUBLANE)
    mp = _round_up(m, tm)
    grid_m = mp // tm

    # Only the activation is padded per call (lane-dense hidden, tile-aligned M).
    x2d = jnp.pad(x.reshape(m, hidden), ((0, mp - m), (0, hp - hidden)))

    out2d = pl.pallas_call(
        _stacked_linear_kernel,
        out_shape=jax.ShapeDtypeStruct((mp, hp), x.dtype),
        grid_spec=pltpu.PrefetchScalarGridSpec(
            num_scalar_prefetch=0,
            grid=(grid_m,),
            in_specs=[
                # Activation tile: one block per grid step.
                pl.BlockSpec((tm, hp), lambda i: (i, 0)),
                # Whole weight stack, constant across the grid -> fetched once.
                pl.BlockSpec((num_layers, hp, hp), lambda i: (0, 0, 0)),
                # Whole bias stack, constant across the grid.
                pl.BlockSpec((num_layers, 1, hp), lambda i: (0, 0, 0)),
            ],
            out_specs=pl.BlockSpec((tm, hp), lambda i: (i, 0)),
        ),
        compiler_params=pltpu.CompilerParams(
            # Megacore sharding only pays off with >1 independent M tile.
            dimension_semantics=(("parallel",) if grid_m > 1 else ("arbitrary",)),
        ),
    )(x2d, w_p, b_p)

    return out2d[:m, :hidden].reshape(batch, seq, hidden)


def init_params(key, num_layers, hidden):
    """torch.nn.Linear-style U(-1/sqrt(in), 1/sqrt(in)) init (torch layout)."""
    kw, kb = jax.random.split(key)
    bound = 1.0 / jnp.sqrt(jnp.float32(hidden))
    w_torch = jax.random.uniform(
        kw, (num_layers, hidden, hidden), jnp.float32, -bound, bound
    )
    b_stack = jax.random.uniform(kb, (num_layers, hidden), jnp.float32, -bound, bound)
    return w_torch, b_stack


def reference_forward(x, w_torch, b_stack):
    """Pure-JAX reference with matching numerics (bf16 MXU operands, f32 accum)."""
    batch, seq, hidden = x.shape
    act = x.reshape(batch * seq, hidden).astype(jnp.float32)
    for l in range(w_torch.shape[0]):
        act = (
            jnp.dot(
                act.astype(jnp.bfloat16),
                jnp.transpose(w_torch[l]).astype(jnp.bfloat16),
                preferred_element_type=jnp.float32,
            )
            + b_stack[l]
        )
    return act.reshape(batch, seq, hidden).astype(x.dtype)


if __name__ == "__main__":
    key = jax.random.PRNGKey(0)
    kx, kp = jax.random.split(key)

    x = jax.random.normal(kx, (BATCH, SEQ, HIDDEN), jnp.float32).astype(jnp.bfloat16)
    w_torch, b_stack = init_params(kp, NUM_LAYERS, HIDDEN)

    # One-time param preprocessing (padding + transpose hoisted off the fwd path).
    hp = _round_up(HIDDEN, LANE)
    w_p, b_p = prepare_params(w_torch, b_stack, hp)
    w_p, b_p = jax.block_until_ready((w_p, b_p))

    # 16 tokens -> a single 16-row M tile, single grid step, layer loop unrolled.
    out = multi_module_forward(x, w_p, b_p, tm=16)
    out = jax.block_until_ready(out)

    ref = reference_forward(x, w_torch, b_stack)
    assert out.shape == (BATCH, SEQ, HIDDEN)
    assert jnp.allclose(
        out.astype(jnp.float32), ref.astype(jnp.float32), atol=2e-2, rtol=2e-2
    )

    print("KERNEL_OK")
</pallas_src>

<mosaic_0001>
module attributes {stable_mosaic.version = 11 : i64} {
  func.func @_stacked_linear_kernel(%arg0: i32, %arg1: memref<16x128xbf16, #tpu.memory_space<vmem>>, %arg2: memref<3x128x128xbf16, #tpu.memory_space<vmem>>, %arg3: memref<3x1x128xf32, #tpu.memory_space<vmem>>, %arg4: memref<16x128xbf16, #tpu.memory_space<vmem>>) attributes {dimension_semantics = [#tpu.dimension_semantics<arbitrary>], iteration_bounds = array<i64: 1>, scalar_prefetch = 0 : i64, scratch_operands = 0 : i64, tpu.core_type = #tpu.core_type<tc>, window_params = [{transform_indices = @transform_0, window_bounds = array<i64: 16, 128>}, {pipeline_mode = #tpu.pipeline_mode<synchronous>, transform_indices = @transform_1, window_bounds = array<i64: 3, 128, 128>}, {pipeline_mode = #tpu.pipeline_mode<synchronous>, transform_indices = @transform_2, window_bounds = array<i64: 3, 1, 128>}, {transform_indices = @transform_3, window_bounds = array<i64: 16, 128>}]} {
    %c0 = arith.constant 0 : index
    %c0_0 = arith.constant 0 : index
    %0 = vector.load %arg1[%c0, %c0_0] : memref<16x128xbf16, #tpu.memory_space<vmem>>, vector<16x128xbf16>
    %c0_1 = arith.constant 0 : index
    %c0_2 = arith.constant 0 : index
    %c0_3 = arith.constant 0 : index
    %1 = vector.load %arg2[%c0_1, %c0_2, %c0_3] : memref<3x128x128xbf16, #tpu.memory_space<vmem>>, vector<1x128x128xbf16>
    %2 = vector.shape_cast %1 : vector<1x128x128xbf16> to vector<128x128xbf16>
    %cst = arith.constant dense<0.000000e+00> : vector<16x128xf32>
    %3 = tpu.matmul %0, %2, %cst {dimension_numbers = #tpu.dot_dimension_numbers<[1], [0], [0], [1], [0, 0, 1, 1], [], []>} : vector<16x128xbf16>, vector<128x128xbf16>, vector<16x128xf32> -> vector<16x128xf32>
    %c0_4 = arith.constant 0 : index
    %c0_5 = arith.constant 0 : index
    %c0_6 = arith.constant 0 : index
    %4 = vector.load %arg3[%c0_4, %c0_5, %c0_6] : memref<3x1x128xf32, #tpu.memory_space<vmem>>, vector<1x1x128xf32>
    %5 = vector.shape_cast %4 : vector<1x1x128xf32> to vector<1x128xf32>
    %6 = vector.broadcast %5 : vector<1x128xf32> to vector<16x128xf32>
    %7 = arith.addf %3, %6 : vector<16x128xf32>
    %8 = arith.truncf %7 : vector<16x128xf32> to vector<16x128xbf16>
    %c1 = arith.constant 1 : index
    %c0_7 = arith.constant 0 : index
    %c0_8 = arith.constant 0 : index
    %9 = vector.load %arg2[%c1, %c0_7, %c0_8] : memref<3x128x128xbf16, #tpu.memory_space<vmem>>, vector<1x128x128xbf16>
    %10 = vector.shape_cast %9 : vector<1x128x128xbf16> to vector<128x128xbf16>
    %cst_9 = arith.constant dense<0.000000e+00> : vector<16x128xf32>
    %11 = tpu.matmul %8, %10, %cst_9 {dimension_numbers = #tpu.dot_dimension_numbers<[1], [0], [0], [1], [0, 0, 1, 1], [], []>} : vector<16x128xbf16>, vector<128x128xbf16>, vector<16x128xf32> -> vector<16x128xf32>
    %c1_10 = arith.constant 1 : index
    %c0_11 = arith.constant 0 : index
    %c0_12 = arith.constant 0 : index
    %12 = vector.load %arg3[%c1_10, %c0_11, %c0_12] : memref<3x1x128xf32, #tpu.memory_space<vmem>>, vector<1x1x128xf32>
    %13 = vector.shape_cast %12 : vector<1x1x128xf32> to vector<1x128xf32>
    %14 = vector.broadcast %13 : vector<1x128xf32> to vector<16x128xf32>
    %15 = arith.addf %11, %14 : vector<16x128xf32>
    %16 = arith.truncf %15 : vector<16x128xf32> to vector<16x128xbf16>
    %c2 = arith.constant 2 : index
    %c0_13 = arith.constant 0 : index
    %c0_14 = arith.constant 0 : index
    %17 = vector.load %arg2[%c2, %c0_13, %c0_14] : memref<3x128x128xbf16, #tpu.memory_space<vmem>>, vector<1x128x128xbf16>
    %18 = vector.shape_cast %17 : vector<1x128x128xbf16> to vector<128x128xbf16>
    %cst_15 = arith.constant dense<0.000000e+00> : vector<16x128xf32>
    %19 = tpu.matmul %16, %18, %cst_15 {dimension_numbers = #tpu.dot_dimension_numbers<[1], [0], [0], [1], [0, 0, 1, 1], [], []>} : vector<16x128xbf16>, vector<128x128xbf16>, vector<16x128xf32> -> vector<16x128xf32>
    %c2_16 = arith.constant 2 : index
    %c0_17 = arith.constant 0 : index
    %c0_18 = arith.constant 0 : index
    %20 = vector.load %arg3[%c2_16, %c0_17, %c0_18] : memref<3x1x128xf32, #tpu.memory_space<vmem>>, vector<1x1x128xf32>
    %21 = vector.shape_cast %20 : vector<1x1x128xf32> to vector<1x128xf32>
    %22 = vector.broadcast %21 : vector<1x128xf32> to vector<16x128xf32>
    %23 = arith.addf %19, %22 : vector<16x128xf32>
    %24 = arith.truncf %23 : vector<16x128xf32> to vector<16x128xbf16>
    %c0_19 = arith.constant 0 : index
    %c0_20 = arith.constant 0 : index
    %25 = vector.load %arg4[%c0_19, %c0_20] : memref<16x128xbf16, #tpu.memory_space<vmem>>, vector<16x128xbf16>
    tpu.vector_store %arg4[%c0_19, %c0_20], %24 {strides = array<i32>} : memref<16x128xbf16, #tpu.memory_space<vmem>>, vector<16x128xbf16>,
    return
  }
  func.func @transform_0(%arg0: i32) -> (i32, i32) {
    %c0_i32 = arith.constant 0 : i32
    %c0_i32_0 = arith.constant 0 : i32
    return %arg0, %c0_i32 : i32, i32
  }
  func.func @transform_1(%arg0: i32) -> (i32, i32, i32) {
    %c0_i32 = arith.constant 0 : i32
    %c0_i32_0 = arith.constant 0 : i32
    %c0_i32_1 = arith.constant 0 : i32
    %c0_i32_2 = arith.constant 0 : i32
    return %c0_i32, %c0_i32_0, %c0_i32_1 : i32, i32, i32
  }
  func.func @transform_2(%arg0: i32) -> (i32, i32, i32) {
    %c0_i32 = arith.constant 0 : i32
    %c0_i32_0 = arith.constant 0 : i32
    %c0_i32_1 = arith.constant 0 : i32
    %c0_i32_2 = arith.constant 0 : i32
    return %c0_i32, %c0_i32_0, %c0_i32_1 : i32, i32, i32
  }
  func.func @transform_3(%arg0: i32) -> (i32, i32) {
    %c0_i32 = arith.constant 0 : i32
    %c0_i32_0 = arith.constant 0 : i32
    return %arg0, %c0_i32 : i32, i32
  }
}

</mosaic_0001>

<bundles_post_ra>
// kernel: tpu_custom_call.1
= control target key start
LH: loop header
LB: loop body
LE: loop exit
PB: predicated region body
PF: predicated region fallthrough
CT: control target
= control target key end

     0   :  { %8 = vsyncpa [#allocation3], 0  ;;  %s763_s0 = inlined_call_operand.hbm [shape: bf16[16,128], index: 0, kind: input, shape index: {}]   ;;  %s764_s1 = inlined_call_operand.hbm [shape: bf16[3,128,128], index: 1, kind: input, shape index: {}]   ;;  %s765_s2 = inlined_call_operand.vmem [shape: f32[3,1,128], index: 2, kind: input, shape index: {}]   ;;  %s766_s3 = inlined_call_operand.hbm [shape: bf16[16,128], index: 3, kind: output, shape index: {}]  }
   0x1   :  { %9 = vsyncpa [#allocation6], 0 }
   0x2   :  { %10 = vsyncpa [#allocation4], 0  ;;  %s652_s12 = smov [#allocation2]   ;;  %s580_s16 = scalar_lea.hbm %s763_s0, 128 }
   0x3   :  { %s16_s13 = sshll.u32 %s652_s12, 4  ;;  %p581_p0 = scmp.ne.s32.totalorder %s763_s0, %s580_s16  ;;  %s17_s13 = int_to_ptr.vmem [resolvable:$true] %s16_s13 }
   0x4   :  { %p584_p1 = scmp.lt.u32.totalorder %s580_s16, %s763_s0 }
   0x6   :  { %p586_p2 = pnand %p584_p1, %p581_p0 }
   0x8   :  { %589 = shalt.err (!%p586_p2)
}
   0x9   :  { %s590_s21 = scalar_lea.vmem %s17_s13, 128  ;;  %p595_p4 = scmp.lt.s32.totalorder %s17_s13, %s17_s13 }
   0xa   :  { %p591_p3 = scmp.ne.s32.totalorder %s17_s13, %s590_s21  ;;  %p596_p5 = scmp.lt.s32.totalorder %s590_s21, %s590_s21 }
   0xc   :  { %p597_p6 = por %p596_p5, %p595_p4 }
   0xe   :  { %p598_p7 = pnand %p597_p6, %p591_p3 }
  0x10   :  { %601 = shalt.err (!%p598_p7)
}
  0x11   :  { %s653_s22 = smov 64   ;;  %s654_s23 = smov 4  }
  0x12   :  { %22 = dma.hbm_to_vmem [thread:$0]  %s763_s0, 128, %s17_s13, [#allocation3], %s653_s22, %s653_s22, %s654_s23  }
  0x13   :  { %s655_s26 = smov [#allocation5]   ;;  %s602_s30 = scalar_lea.hbm %s764_s1, 3072 }
  0x14   :  { %s28_s27 = sshll.u32 %s655_s26, 4  ;;  %p603_p8 = scmp.ne.s32.totalorder %s764_s1, %s602_s30  ;;  %s29_s27 = int_to_ptr.vmem [resolvable:$true] %s28_s27 }
  0x15   :  { %p606_p9 = scmp.lt.u32.totalorder %s602_s30, %s764_s1 }
  0x17   :  { %p608_p10 = pnand %p606_p9, %p603_p8 }
  0x19   :  { %611 = shalt.err (!%p608_p10)
}
  0x1a   :  { %s612_s8 = scalar_lea.vmem %s29_s27, 3072  ;;  %p617_p12 = scmp.lt.s32.totalorder %s29_s27, %s29_s27 }
  0x1b   :  { %p613_p11 = scmp.ne.s32.totalorder %s29_s27, %s612_s8  ;;  %p618_p13 = scmp.lt.s32.totalorder %s612_s8, %s612_s8 }
  0x1d   :  { %p619_p0 = por %p618_p13, %p617_p12 }
  0x1f   :  { %p620_p1 = pnand %p619_p0, %p613_p11 }
  0x21   :  { %623 = shalt.err (!%p620_p1)
}
  0x22   :  { %34 = dma.hbm_to_vmem [thread:$0]  %s764_s1, 3072, %s29_s27, [#allocation6], %s653_s22, %s653_s22, %s654_s23  }
  0x23   :  { %646 = dma.done.wait [#allocation3], 128  }
  0x24   :  { %647 = vsyncadd [#allocation3], 4294967168 }
  0x25   :  { %648 = dma.done.wait [#allocation6], 3072  }
  0x26   :  { %649 = vsyncadd [#allocation6], 4294964224  ;;  %v656_v0 = vmov 0.0   ;;  %vm657_vm0 = vmmov 0   ;;  %v555_v1 = vld [vmem:[#allocation5] sm:$0xff]   ;;  %v556_v2 = vld [vmem:[#allocation5 + $0x8] sm:$0xff]  }
  0x27   :  { %488 = vmatprep.subr.bf16.mxu0 %v656_v0  ;;  %504 = vmatprep.mubr.msk.bf16.mxu0 %vm657_vm0, %v656_v0  ;;  %v557_v3 = vld [vmem:[#allocation5 + $0x10] sm:$0xff]   ;;  %v564_v4 = vld [vmem:[#allocation5 + $0x40] sm:$0xff]   ;;  %v558_v5 = vld [vmem:[#allocation5 + $0x18] sm:$0xff]   ;;  %s658_s15 = smov [#allocation7]  }
  0x28   :  { %508 = vmatprep.subr.bf16.mxu1 %v656_v0  ;;  %524 = vmatprep.mubr.msk.bf16.mxu1 %vm657_vm0, %v656_v0  ;;  %v565_v6 = vld [vmem:[#allocation5 + $0x48] sm:$0xff]   ;;  %v559_v7 = vld [vmem:[#allocation5 + $0x20] sm:$0xff]   ;;  %v566_v8 = vld [vmem:[#allocation5 + $0x50] sm:$0xff]   ;;  %s409_s16 = sshll.u32 %s658_s15, 4  ;;  %s410_s16 = int_to_ptr.vmem [resolvable:$true] %s409_s16 }
  0x29   :  { %489 = vmatpush3.bf16.msra.mxu0 %v555_v1  ;;  %509 = vmatpush3.bf16.msra.mxu1 %v564_v4  ;;  %v560_v9 = vld [vmem:[#allocation5 + $0x28] sm:$0xff]   ;;  %v567_v10 = vld [vmem:[#allocation5 + $0x58] sm:$0xff]   ;;  %v561_v11 = vld [vmem:[#allocation5 + $0x30] sm:$0xff]   ;;  %s624_s17 = scalar_lea.vmem %s410_s16, 128  ;;  %p629_p3 = scmp.lt.s32.totalorder %s410_s16, %s410_s16 }
  0x2a   :  { %490 = vmatprep.subr.bf16.mxu0 %v656_v0  ;;  %510 = vmatprep.subr.bf16.mxu1 %v656_v0  ;;  %v568_v12 = vld [vmem:[#allocation5 + $0x60] sm:$0xff]   ;;  %v562_v13 = vld [vmem:[#allocation5 + $0x38] sm:$0xff]   ;;  %v569_v14 = vld [vmem:[#allocation5 + $0x68] sm:$0xff]   ;;  %p625_p2 = scmp.ne.s32.totalorder %s410_s16, %s624_s17  ;;  %p630_p4 = scmp.lt.s32.totalorder %s624_s17, %s624_s17 }
  0x2b   :  { %v563_v15 = vld [vmem:[#allocation2] sm:$0xff]   ;;  %v570_v16 = vld [vmem:[#allocation5 + $0x70] sm:$0xff]   ;;  %v572_v18 = vld [vmem:[#allocation5 + $0x80] sm:$0xff]  }
  0x2c   :  { %v571_v17 = vld [vmem:[#allocation5 + $0x78] sm:$0xff]   ;;  %v573_v19 = vld [vmem:[#allocation5 + $0x88] sm:$0xff]   ;;  %v574_v20 = vld [vmem:[#allocation5 + $0x90] sm:$0xff]   ;;  %p631_p5 = por %p630_p4, %p629_p3 }
  0x2d   :  { %491 = vmatpush3.bf16.msra.mxu0 %v556_v2  ;;  %511 = vmatpush3.bf16.msra.mxu1 %v565_v6  ;;  %v575_v21 = vld [vmem:[#allocation5 + $0x98] sm:$0xff]   ;;  %v576_v22 = vld [vmem:[#allocation5 + $0xa0] sm:$0xff]   ;;  %v577_v23 = vld [vmem:[#allocation5 + $0xa8] sm:$0xff]  }
  0x2e   :  { %492 = vmatprep.subr.bf16.mxu0 %v656_v0  ;;  %512 = vmatprep.subr.bf16.mxu1 %v656_v0  ;;  %v422_v24 = vld [vmem:[%s765_s2] ss:$0 sm:$0xff]  ;;  %v578_v32 = vld [vmem:[#allocation5 + $0xb0] sm:$0xff]   ;;  %v433_v34 = vld [vmem:[%s765_s2 + $0x1] ss:$0 sm:$0xff]  ;;  %p632_p6 = pnand %p631_p5, %p625_p2 }
  0x2f   :  { %v579_v33 = vld [vmem:[#allocation5 + $0xb8] sm:$0xff]  }
  0x30   :  { %v443_v42 = vld [vmem:[%s765_s2 + $0x2] ss:$0 sm:$0xff] }
  0x31   :  { %493 = vmatpush3.bf16.msra.mxu0 %v557_v3  ;;  %513 = vmatpush3.bf16.msra.mxu1 %v566_v8 }
  0x32   :  { %494 = vmatprep.subr.bf16.mxu0 %v656_v0  ;;  %514 = vmatprep.subr.bf16.mxu1 %v656_v0 }
  0x35   :  { %495 = vmatpush3.bf16.msra.mxu0 %v558_v5  ;;  %515 = vmatpush3.bf16.msra.mxu1 %v567_v10 }
  0x36   :  { %496 = vmatprep.subr.bf16.mxu0 %v656_v0  ;;  %516 = vmatprep.subr.bf16.mxu1 %v656_v0 }
  0x39   :  { %497 = vmatpush3.bf16.msra.mxu0 %v559_v7  ;;  %517 = vmatpush3.bf16.msra.mxu1 %v568_v12 }
  0x3a   :  { %498 = vmatprep.subr.bf16.mxu0 %v656_v0  ;;  %518 = vmatprep.subr.bf16.mxu1 %v656_v0 }
  0x3d   :  { %499 = vmatpush3.bf16.msra.mxu0 %v560_v9  ;;  %519 = vmatpush3.bf16.msra.mxu1 %v569_v14 }
  0x3e   :  { %500 = vmatprep.subr.bf16.mxu0 %v656_v0  ;;  %520 = vmatprep.subr.bf16.mxu1 %v656_v0 }
  0x41   :  { %501 = vmatpush3.bf16.msra.mxu0 %v561_v11  ;;  %521 = vmatpush3.bf16.msra.mxu1 %v570_v16 }
  0x42   :  { %502 = vmatprep.subr.bf16.mxu0 %v656_v0  ;;  %522 = vmatprep.subr.bf16.mxu1 %v656_v0 }
  0x45   :  { %503 = vmatpush3.bf16.msra.mxu0 %v562_v13  ;;  %523 = vmatpush3.bf16.msra.mxu1 %v571_v17 }
  0x46   :  { %528 = vmatprep.subr.bf16.mxu0 %v656_v0 }
  0x48   :  { %505 = vmatmul.mubr.bf16.vlgmr.msra.gmra.mrb[0].mxu0 %v563_v15 }
  0x49   :  { %544 = vmatprep.mubr.msk.bf16.mxu0 %vm657_vm0, %v656_v0  ;;  %529 = vmatpush3.bf16.msra.mxu0 %v572_v18 }
  0x4a   :  { %530 = vmatprep.subr.bf16.mxu0 %v656_v0 }
  0x4d   :  { %531 = vmatpush3.bf16.msra.mxu0 %v573_v19 }
  0x4e   :  { %532 = vmatprep.subr.bf16.mxu0 %v656_v0 }
  0x51   :  { %533 = vmatpush3.bf16.msra.mxu0 %v574_v20 }
  0x52   :  { %534 = vmatprep.subr.bf16.mxu0 %v656_v0 }
  0x55   :  { %535 = vmatpush3.bf16.msra.mxu0 %v575_v21 }
  0x56   :  { %536 = vmatprep.subr.bf16.mxu0 %v656_v0 }
  0x59   :  { %537 = vmatpush3.bf16.msra.mxu0 %v576_v22 }
  0x5a   :  { %538 = vmatprep.subr.bf16.mxu0 %v656_v0 }
  0x5d   :  { %539 = vmatpush3.bf16.msra.mxu0 %v577_v23 }
  0x5e   :  { %540 = vmatprep.subr.bf16.mxu0 %v656_v0 }
  0x61   :  { %541 = vmatpush3.bf16.msra.mxu0 %v578_v32 }
  0x62   :  { %542 = vmatprep.subr.bf16.mxu0 %v656_v0 }
  0x65   :  { %543 = vmatpush3.bf16.msra.mxu0 %v579_v33 }
 0x11b   :  { %v157_v25 = vpop.f32.mrb[0].mxu0 }
 0x11c   :  { %v506_v26 = vpop.f32.mrb[1].mxu0  ;;  %v158_v28 = vadd.f32 %v422_v24, %v157_v25 }
 0x11d   :  { %v160_v27 = vpop.f32.mrb[2].mxu0 }
 0x11e   :  { %v161_v29 = vadd.f32 %v422_v24, %v160_v27  ;;  %v507_v30 = vpop.f32.mrb[3].mxu0 }
 0x120   :  { %v164_v31 = vpack.c.bf16 %v161_v29, %v158_v28 }
 0x122   :  { %525 = vmatmul.mubr.bf16.vlgmr.msra.gmra.mrb[0].mxu1 %v164_v31 }
 0x1f5   :  { %v272_v35 = vpop.f32.mrb[0].mxu1 }
 0x1f6   :  { %v526_v36 = vpop.f32.mrb[1].mxu1  ;;  %v273_v38 = vadd.f32 %v433_v34, %v272_v35 }
 0x1f7   :  { %v275_v37 = vpop.f32.mrb[2].mxu1 }
 0x1f8   :  { %v276_v39 = vadd.f32 %v433_v34, %v275_v37  ;;  %v527_v40 = vpop.f32.mrb[3].mxu1 }
 0x1fa   :  { %v279_v41 = vpack.c.bf16 %v276_v39, %v273_v38 }
 0x1fc   :  { %545 = vmatmul.mubr.bf16.vlgmr.msra.gmra.mrb[4].mxu0 %v279_v41 }
 0x2cf   :  { %v387_v43 = vpop.f32.mrb[4].mxu0 }
 0x2d0   :  { %v546_v44 = vpop.f32.mrb[5].mxu0  ;;  %v388_v46 = vadd.f32 %v443_v42, %v387_v43 }
 0x2d1   :  { %v390_v45 = vpop.f32.mrb[6].mxu0 }
 0x2d2   :  { %v391_v47 = vadd.f32 %v443_v42, %v390_v45  ;;  %v547_v48 = vpop.f32.mrb[7].mxu0 }
 0x2d4   :  { %v459_v49 = vpack.c.bf16 %v391_v47, %v388_v46 }
 0x2d6   :  { %460 = vst [vmem:[#allocation7] sm:$0xff] %v459_v49  }
 0x2d7   :  { %635 = shalt.err (!%p632_p6)
}
 0x2d8   :  { %s636_s19 = scalar_lea.hbm %s766_s3, 128 }
 0x2d9   :  { %p637_p7 = scmp.ne.s32.totalorder %s766_s3, %s636_s19  ;;  %p640_p8 = scmp.lt.u32.totalorder %s636_s19, %s766_s3 }
 0x2db   :  { %p642_p9 = pnand %p640_p8, %p637_p7 }
 0x2dd   :  { %645 = shalt.err (!%p642_p9)
}
 0x2de   :  { %415 = dma.vmem_to_hbm [thread:$0]  %s410_s16, 128, %s766_s3, [#allocation4], %s653_s22, %s653_s22, %s654_s23  }
 0x2df   :  { %650 = dma.done.wait [#allocation4], 128  }
 0x2e0   :  { %651 = vsyncadd [#allocation4], 4294967168 }
 0x2e1   :  { %419 = vsyncpa [#allocation3], 1 }
 0x2e2   :  { %420 = vsyncpa [#allocation6], 1 }
 0x2e3   :  { %421 = vsyncpa [#allocation4], 1 }

</bundles_post_ra>
